<compile_context>
chip_gen: v6e
topology: v6e:2x2x1
jax: 0.10.0
libtpu: 0.0.40
codegen_flags: <defaults>
</compile_context>

<pallas_src>
import functools

import jax
import jax.numpy as jnp
from jax import lax
from jax.experimental import pallas as pl
from jax.experimental.pallas import tpu as pltpu

_MIB = 1024 * 1024


def _round_up(n: int, m: int) -> int:
    return ((n + m - 1) // m) * m


def _merge_norm_reduce_kernel(x_ref, gamma_ref, beta_ref, w_ref, o_ref, *, eps):
    """Fused LayerNorm + (no-bias) Linear on one row tile.

    x_ref     : VMEM (TR, 4C)   merged-patch features
    gamma_ref : VMEM (1, 4C)    LayerNorm weight
    beta_ref  : VMEM (1, 4C)    LayerNorm bias
    w_ref     : VMEM (4C, 2C)   reduction weight (already transposed)
    o_ref     : VMEM (TR, 2C)
    """
    x = x_ref[...].astype(jnp.float32)
    n = jnp.float32(x.shape[-1])
    # One-pass statistics: E[x] and E[x^2] (biased variance, matches nn.LayerNorm).
    s1 = jnp.sum(x, axis=-1, keepdims=True)
    s2 = jnp.sum(x * x, axis=-1, keepdims=True)
    mean = s1 / n
    var = jnp.maximum(s2 / n - mean * mean, 0.0)
    inv = lax.rsqrt(var + jnp.float32(eps))
    y = (x - mean) * inv * gamma_ref[...].astype(jnp.float32) + beta_ref[...].astype(jnp.float32)
    # Feed the MXU operands in the weight's dtype (bf16 weight -> bf16 matmul),
    # accumulate in f32.
    o_ref[...] = jnp.dot(
        y.astype(w_ref.dtype), w_ref[...], preferred_element_type=jnp.float32
    ).astype(o_ref.dtype)


def _pick_row_tile(rows, c4, c2, act_isz, w_isz, row_tile):
    """Row-tile size: VMEM-budgeted (v7x-safe), overhead-amortizing, >=4 grid steps."""
    if row_tile is not None:
        tr = int(row_tile)
    else:
        # Per-row VMEM cost: double-buffered in/out tiles + f32 LN temporaries.
        per_row = 2 * (c4 + c2) * act_isz + 3 * c4 * 4
        weight_bytes = 2 * c4 * c2 * w_isz  # conservatively assume double-buffered
        budget = max(4 * _MIB, 40 * _MIB - weight_bytes - _MIB)
        tr = budget // per_row
    tr = min(tr, 2048)                                  # diminishing returns past this
    tr = min(tr, _round_up(pl.cdiv(rows, 4), 8))        # keep >= ~4 grid steps (v7x megacore)
    tr = min(tr, _round_up(rows, 8))
    return max(8, (tr // 8) * 8)


def _vmem_limit_bytes(tr, c4, c2, act_isz, w_isz):
    need = (
        2 * tr * (c4 + c2) * act_isz   # double-buffered input/output tiles
        + 3 * tr * c4 * 4              # f32 LN temporaries inside the kernel
        + 2 * c4 * c2 * w_isz          # resident weight (counted twice, worst case)
        + 4 * c4 * 4                   # gamma / beta
    )
    # Floor covers v5e's 16 MiB default scoped VMEM; cap stays under v7x's 64 MiB.
    return int(min(max(need + 8 * _MIB, 32 * _MIB), 50 * _MIB))


def patch_merging(x, gamma, beta, weight, input_resolution, *, eps=1e-5, row_tile=None):
    """JAX/Pallas equivalent of PatchMerging.forward.

    x      : (B, H*W, C)
    gamma  : (4C,)   LayerNorm weight
    beta   : (4C,)   LayerNorm bias
    weight : (4C, 2C)  reduction weight (transpose of the PyTorch nn.Linear weight)
    returns: (B, H*W/4, 2C)
    """
    h, w = input_resolution
    b, seq_len, c = x.shape
    assert seq_len == h * w, "input feature has wrong size"
    assert h % 2 == 0 and w % 2 == 0, f"x size ({h}*{w}) are not even."
    c4 = 4 * c
    c2 = weight.shape[1]
    assert weight.shape[0] == c4

    # --- 2x2 patch merge (layout plumbing in the wrapper) ---------------------
    # torch.cat([x0, x1, x2, x3], -1) ordering is (w_parity slow, h_parity fast, c).
    # NOTE: this is the one remaining extra HBM round trip (XLA transpose copy);
    # fusing it into the kernel needs in-VMEM minor-dim relayouts, traded away
    # here for lowering robustness.
    xm = x.reshape(b, h // 2, 2, w // 2, 2, c)           # (b, h2, hp, w2, wp, c)
    xm = jnp.transpose(xm, (0, 1, 3, 4, 2, 5))           # (b, h2, w2, wp, hp, c)
    xm = xm.reshape(b * (h // 2) * (w // 2), c4)         # (rows, 4C), dtype preserved
    rows = xm.shape[0]

    act_isz = xm.dtype.itemsize
    w_isz = weight.dtype.itemsize
    tr = _pick_row_tile(rows, c4, c2, act_isz, w_isz, row_tile)
    grid = (pl.cdiv(rows, tr),)                          # ragged last block, no padding copy

    out = pl.pallas_call(
        functools.partial(_merge_norm_reduce_kernel, eps=eps),
        out_shape=jax.ShapeDtypeStruct((rows, c2), x.dtype),
        grid_spec=pltpu.PrefetchScalarGridSpec(
            num_scalar_prefetch=0,
            grid=grid,
            in_specs=[
                pl.BlockSpec((tr, c4), lambda i: (i, 0)),   # merged features (tiled rows)
                pl.BlockSpec((1, c4), lambda i: (0, 0)),    # LN gamma (resident)
                pl.BlockSpec((1, c4), lambda i: (0, 0)),    # LN beta  (resident)
                pl.BlockSpec((c4, c2), lambda i: (0, 0)),   # reduction weight (resident)
            ],
            out_specs=pl.BlockSpec((tr, c2), lambda i: (i, 0)),
        ),
        compiler_params=pltpu.CompilerParams(
            dimension_semantics=("parallel",),
            vmem_limit_bytes=_vmem_limit_bytes(tr, c4, c2, act_isz, w_isz),
        ),
    )(xm, gamma.reshape(1, c4), beta.reshape(1, c4), weight)

    return out.reshape(b, (h // 2) * (w // 2), c2)


class PatchMerging:
    """Mirror of the PyTorch PatchMerging module (inference weights held as arrays)."""

    def __init__(self, input_resolution, dim, key=None, dtype=jnp.float32, eps=1e-5):
        self.input_resolution = input_resolution
        self.dim = dim
        self.eps = eps
        if key is None:
            key = jax.random.PRNGKey(0)
        bound = 1.0 / float(4 * dim) ** 0.5
        # Stored as (4*dim, 2*dim) = transpose of nn.Linear(4*dim, 2*dim).weight.
        # For peak MXU throughput pass dtype=jnp.bfloat16.
        self.weight = jax.random.uniform(key, (4 * dim, 2 * dim), dtype, -bound, bound)
        self.gamma = jnp.ones((4 * dim,), dtype)   # nn.LayerNorm default weight
        self.beta = jnp.zeros((4 * dim,), dtype)   # nn.LayerNorm default bias

    def __call__(self, x):
        return patch_merging(
            x, self.gamma, self.beta, self.weight, self.input_resolution, eps=self.eps
        )


def _reference(x, gamma, beta, weight, input_resolution, eps):
    """Pure-JAX f32 reference of the PyTorch forward (for correctness checking)."""
    h, w = input_resolution
    b, _, c = x.shape
    xv = x.astype(jnp.float32).reshape(b, h, w, c)
    x0 = xv[:, 0::2, 0::2, :]
    x1 = xv[:, 1::2, 0::2, :]
    x2 = xv[:, 0::2, 1::2, :]
    x3 = xv[:, 1::2, 1::2, :]
    xm = jnp.concatenate([x0, x1, x2, x3], axis=-1).reshape(b, -1, 4 * c)
    mean = jnp.mean(xm, axis=-1, keepdims=True)
    var = jnp.mean((xm - mean) ** 2, axis=-1, keepdims=True)
    xn = (xm - mean) / jnp.sqrt(var + eps) * gamma.astype(jnp.float32) + beta.astype(jnp.float32)
    return xn @ weight.astype(jnp.float32)


if __name__ == "__main__":
    key = jax.random.PRNGKey(0)
    k_x, k_w, k_g, k_b = jax.random.split(key, 4)

    B, H, W, C = 2, 16, 16, 4
    x = jax.random.normal(k_x, (B, H * W, C), dtype=jnp.float32)

    mod = PatchMerging((H, W), C, key=k_w)
    # Non-trivial affine params so the LayerNorm path is actually exercised.
    mod.gamma = 1.0 + 0.1 * jax.random.normal(k_g, (4 * C,), jnp.float32)
    mod.beta = 0.1 * jax.random.normal(k_b, (4 * C,), jnp.float32)

    # --- f32 path: strict correctness check -----------------------------------
    y = jax.block_until_ready(mod(x))
    y_ref = _reference(x, mod.gamma, mod.beta, mod.weight, (H, W), mod.eps)
    assert y.shape == (B, H * W // 4, 2 * C), y.shape
    max_err = float(jnp.max(jnp.abs(y - y_ref)))
    assert jnp.allclose(y, y_ref, rtol=1e-5, atol=1e-5), f"f32 max abs err = {max_err}"

    # --- bf16 path (bf16 activations + bf16 weight -> bf16 MXU), loose check --
    x_bf = x.astype(jnp.bfloat16)
    g_bf = mod.gamma.astype(jnp.bfloat16)
    b_bf = mod.beta.astype(jnp.bfloat16)
    w_bf = mod.weight.astype(jnp.bfloat16)
    y_bf = jax.block_until_ready(
        patch_merging(x_bf, g_bf, b_bf, w_bf, (H, W), eps=mod.eps)
    )
    y_bf_ref = _reference(x_bf, g_bf, b_bf, w_bf, (H, W), mod.eps)
    max_err_bf = float(jnp.max(jnp.abs(y_bf.astype(jnp.float32) - y_bf_ref)))
    assert jnp.allclose(
        y_bf.astype(jnp.float32), y_bf_ref, rtol=5e-2, atol=5e-2
    ), f"bf16 max abs err = {max_err_bf}"

    print("KERNEL_OK")
</pallas_src>

<mosaic_0001>
module attributes {stable_mosaic.version = 11 : i64} {
  func.func @_merge_norm_reduce_kernel(%arg0: i32, %arg1: memref<32x16xf32, #tpu.memory_space<vmem>>, %arg2: memref<1x16xf32, #tpu.memory_space<vmem>>, %arg3: memref<1x16xf32, #tpu.memory_space<vmem>>, %arg4: memref<16x8xf32, #tpu.memory_space<vmem>>, %arg5: memref<32x8xf32, #tpu.memory_space<vmem>>) attributes {dimension_semantics = [#tpu.dimension_semantics<parallel>], iteration_bounds = array<i64: 4>, scalar_prefetch = 0 : i64, scratch_operands = 0 : i64, tpu.core_type = #tpu.core_type<tc>, window_params = [{transform_indices = @transform_0, window_bounds = array<i64: 32, 16>}, {pipeline_mode = #tpu.pipeline_mode<synchronous>, transform_indices = @transform_1, window_bounds = array<i64: 1, 16>}, {pipeline_mode = #tpu.pipeline_mode<synchronous>, transform_indices = @transform_2, window_bounds = array<i64: 1, 16>}, {pipeline_mode = #tpu.pipeline_mode<synchronous>, transform_indices = @transform_3, window_bounds = array<i64: 16, 8>}, {transform_indices = @transform_4, window_bounds = array<i64: 32, 8>}]} {
    %c0 = arith.constant 0 : index
    %c0_0 = arith.constant 0 : index
    %0 = vector.load %arg1[%c0, %c0_0] : memref<32x16xf32, #tpu.memory_space<vmem>>, vector<32x16xf32>
    %cst = arith.constant dense<0.000000e+00> : vector<32xf32>
    %1 = vector.multi_reduction <add>, %0, %cst [1] : vector<32x16xf32> to vector<32xf32>
    %2 = vector.shape_cast %1 : vector<32xf32> to vector<32x1xf32>
    %3 = arith.mulf %0, %0 : vector<32x16xf32>
    %cst_1 = arith.constant dense<0.000000e+00> : vector<32xf32>
    %4 = vector.multi_reduction <add>, %3, %cst_1 [1] : vector<32x16xf32> to vector<32xf32>
    %5 = vector.shape_cast %4 : vector<32xf32> to vector<32x1xf32>
    %cst_2 = arith.constant 1.600000e+01 : f32
    %6 = vector.broadcast %cst_2 : f32 to vector<32x1xf32>
    %7 = arith.divf %2, %6 : vector<32x1xf32>
    %cst_3 = arith.constant 1.600000e+01 : f32
    %8 = vector.broadcast %cst_3 : f32 to vector<32x1xf32>
    %9 = arith.divf %5, %8 : vector<32x1xf32>
    %10 = arith.mulf %7, %7 : vector<32x1xf32>
    %11 = arith.subf %9, %10 : vector<32x1xf32>
    %cst_4 = arith.constant 0.000000e+00 : f32
    %12 = vector.broadcast %cst_4 : f32 to vector<32x1xf32>
    %13 = arith.maximumf %11, %12 : vector<32x1xf32>
    %cst_5 = arith.constant 9.99999974E-6 : f32
    %14 = vector.broadcast %cst_5 : f32 to vector<32x1xf32>
    %15 = arith.addf %13, %14 : vector<32x1xf32>
    %16 = math.rsqrt %15 : vector<32x1xf32>
    %17 = vector.broadcast %7 : vector<32x1xf32> to vector<32x16xf32>
    %18 = arith.subf %0, %17 : vector<32x16xf32>
    %19 = vector.broadcast %16 : vector<32x1xf32> to vector<32x16xf32>
    %20 = arith.mulf %18, %19 : vector<32x16xf32>
    %c0_6 = arith.constant 0 : index
    %c0_7 = arith.constant 0 : index
    %21 = vector.load %arg2[%c0_6, %c0_7] : memref<1x16xf32, #tpu.memory_space<vmem>>, vector<1x16xf32>
    %22 = vector.broadcast %21 : vector<1x16xf32> to vector<32x16xf32>
    %23 = arith.mulf %20, %22 : vector<32x16xf32>
    %c0_8 = arith.constant 0 : index
    %c0_9 = arith.constant 0 : index
    %24 = vector.load %arg3[%c0_8, %c0_9] : memref<1x16xf32, #tpu.memory_space<vmem>>, vector<1x16xf32>
    %25 = vector.broadcast %24 : vector<1x16xf32> to vector<32x16xf32>
    %26 = arith.addf %23, %25 : vector<32x16xf32>
    %c0_10 = arith.constant 0 : index
    %c0_11 = arith.constant 0 : index
    %27 = vector.load %arg4[%c0_10, %c0_11] : memref<16x8xf32, #tpu.memory_space<vmem>>, vector<16x8xf32>
    %cst_12 = arith.constant dense<0.000000e+00> : vector<32x8xf32>
    %28 = tpu.matmul %26, %27, %cst_12 {dimension_numbers = #tpu.dot_dimension_numbers<[1], [0], [0], [1], [0, 0, 1, 1], [], []>} : vector<32x16xf32>, vector<16x8xf32>, vector<32x8xf32> -> vector<32x8xf32>
    %c0_13 = arith.constant 0 : index
    %c0_14 = arith.constant 0 : index
    %29 = vector.load %arg5[%c0_13, %c0_14] : memref<32x8xf32, #tpu.memory_space<vmem>>, vector<32x8xf32>
    tpu.vector_store %arg5[%c0_13, %c0_14], %28 {strides = array<i32>} : memref<32x8xf32, #tpu.memory_space<vmem>>, vector<32x8xf32>,
    return
  }
  func.func @transform_0(%arg0: i32) -> (i32, i32) {
    %c0_i32 = arith.constant 0 : i32
    %c0_i32_0 = arith.constant 0 : i32
    return %arg0, %c0_i32 : i32, i32
  }
  func.func @transform_1(%arg0: i32) -> (i32, i32) {
    %c0_i32 = arith.constant 0 : i32
    %c0_i32_0 = arith.constant 0 : i32
    %c0_i32_1 = arith.constant 0 : i32
    return %c0_i32, %c0_i32_0 : i32, i32
  }
  func.func @transform_2(%arg0: i32) -> (i32, i32) {
    %c0_i32 = arith.constant 0 : i32
    %c0_i32_0 = arith.constant 0 : i32
    %c0_i32_1 = arith.constant 0 : i32
    return %c0_i32, %c0_i32_0 : i32, i32
  }
  func.func @transform_3(%arg0: i32) -> (i32, i32) {
    %c0_i32 = arith.constant 0 : i32
    %c0_i32_0 = arith.constant 0 : i32
    %c0_i32_1 = arith.constant 0 : i32
    return %c0_i32, %c0_i32_0 : i32, i32
  }
  func.func @transform_4(%arg0: i32) -> (i32, i32) {
    %c0_i32 = arith.constant 0 : i32
    %c0_i32_0 = arith.constant 0 : i32
    return %arg0, %c0_i32 : i32, i32
  }
}

</mosaic_0001>

<bundles_post_ra>
// kernel: tpu_custom_call.1
= control target key start
LH: loop header
LB: loop body
LE: loop exit
PB: predicated region body
PF: predicated region fallthrough
CT: control target
= control target key end

     0   :  { %s539_s15 = smov 0   ;;  %s611_s0 = inlined_call_operand.vmem [shape: f32[128,16], index: 0, kind: input, shape index: {}]   ;;  %s612_s1 = inlined_call_operand.vmem [shape: f32[1,16], index: 1, kind: input, shape index: {}]   ;;  %s613_s2 = inlined_call_operand.vmem [shape: f32[1,16], index: 2, kind: input, shape index: {}]   ;;  %s614_s3 = inlined_call_operand.vmem [shape: f32[16,8], index: 3, kind: input, shape index: {}]   ;;  %s615_s4 = inlined_call_operand.vmem [shape: f32[128,8], index: 4, kind: output, shape index: {}]  }
   0x1 LB: > { %s453_s16 = sadd.s32 4294967295, %s512_s15   ;;  %p457_p0 = scmp.ge.s32.totalorder %s512_s15, 1  ;;  %s512_s15 = sphi %s539_s15, %s14_s15  }
   0x2   : > { %p163_p1 = scmp.lt.s32.totalorder %s512_s15, 5 }
   0x4   : > { %p164_p2 = pnand %p457_p0, %p163_p1 }
   0x5   : > { %s458_s17 = sshll.u32 (!%p164_p2), %s453_s16, 2 }
   0x6   : > { %167 = sbr.rel (%p164_p2) target bundleno = 391 (0x187), region = 36  ;;  %p190_p3 = scmp.lt.s32.totalorder (!%p164_p2), %s458_s17, 15 }
   0xb   : > { %s617_s17 = smov (!%p190_p3, %s458_s17), 15  ;;  %vm205_vm0 = vcmask 130048   ;;  %v294_v16 = vld [vmem:[%s614_s3 + $0x8] sm:$0xff]  ;;  %v293_v17 = vld [vmem:[%s614_s3] sm:$0xff]  ;;  %vm392_vm1 = vcmask 64512  }
   0xc   : > { %s459_s18 = sshll.u32 %s617_s17, 3  ;;  %476 = vmatprep.subr.mxu0 %v294_v16  ;;  %486 = vmatprep.subr.mxu1 %v294_v16  ;;  %v462_v53 = vld [vmem:[%s612_s1] ss:$0 sm:$0xff] }
   0xd   : > { %s193_s21 = scalar_lea.vmem %s611_s0, %s459_s18  ;;  %477 = vmatpush3.msra.mxu0 %v294_v16  ;;  %488 = vmatpush3.msra.mxu1 %v294_v16  ;;  %v463_v57 = vld [vmem:[%s613_s2] ss:$0 sm:$0xff]  ;;  %s199_s6 = scalar_lea.vmem %s615_s4, %s459_s18 }
   0xe   : > { %v555_v0 = vld [vmem:[%s193_s21 + $0x8] sm:$0xff]  ;;  %v557_v1 = vld [vmem:[%s193_s21] sm:$0xff]  ;;  %v559_v2 = vld [vmem:[%s193_s21 + $0x18] sm:$0xff]  ;;  %478 = vmatprep.subr.mxu0 %v293_v17  ;;  %487 = vmatprep.subr.mxu1 %v293_v17 }
   0xf   : > { %v209_v3 = vsel %vm205_vm0, %v555_v0, 0.0  ;;  %v206_v4 = vsel %vm205_vm0, %v557_v1, 0.0  ;;  %v565_v5 = vld [vmem:[%s193_s21 + $0x10] sm:$0xff]  ;;  %v215_v6 = vsel %vm205_vm0, %v559_v2, 0.0  ;;  %v218_v9 = vmul.f32 %v557_v1, %v557_v1  ;;  %479 = vmatpush3.msra.mxu0 %v293_v17  ;;  %489 = vmatpush3.msra.mxu1 %v293_v17 }
  0x10   : > { %210 = vadd.xlane.f32.xlu1 %v209_v3  ;;  %207 = vadd.xlane.f32.xlu0 %v206_v4  ;;  %v212_v7 = vsel %vm205_vm0, %v565_v5, 0.0  ;;  %v220_v8 = vmul.f32 %v565_v5, %v565_v5  ;;  %v221_v12 = vmul.f32 %v559_v2, %v559_v2  ;;  %v219_v13 = vmul.f32 %v555_v0, %v555_v0 }
  0x11   : > { %v222_v11 = vsel %vm205_vm0, %v218_v9, 0.0 }
  0x12   : > { %v228_v10 = vsel %vm205_vm0, %v220_v8, 0.0  ;;  %v231_v14 = vsel %vm205_vm0, %v221_v12, 0.0  ;;  %v225_v15 = vsel %vm205_vm0, %v219_v13, 0.0 }
  0x14   : > { %216 = vadd.xlane.f32.xlu1 %v215_v6  ;;  %213 = vadd.xlane.f32.xlu0 %v212_v7 }
  0x18   : > { %229 = vadd.xlane.f32.xlu1 %v228_v10  ;;  %223 = vadd.xlane.f32.xlu0 %v222_v11 }
  0x1c   : > { %232 = vadd.xlane.f32.xlu1 %v231_v14  ;;  %226 = vadd.xlane.f32.xlu0 %v225_v15 }
  0x99   : > { %v211_v18 = vpop.xlane.xlu1 %210  ;;  %v208_v19 = vpop.xlane.xlu0 %207 }
  0x9a   : > { %v235_v22 = vmul.f32 0.0625, %v208_v19  ;;  %v236_v24 = vmul.f32 0.0625, %v211_v18 }
  0x9c   : > { %v243_v28 = vmul.f32 %v235_v22, %v235_v22  ;;  %v244_v34 = vmul.f32 %v236_v24, %v236_v24  ;;  %v263_v52 = vsub.f32 %v557_v1, %v235_v22  ;;  %v264_v61 = vsub.f32 %v555_v0, %v236_v24 }
  0x9d   : > { %v217_v20 = vpop.xlane.xlu1 %216  ;;  %v214_v21 = vpop.xlane.xlu0 %213 }
  0x9e   : > { %v237_v23 = vmul.f32 0.0625, %v214_v21  ;;  %v238_v25 = vmul.f32 0.0625, %v217_v20 }
  0xa0   : > { %v245_v29 = vmul.f32 %v237_v23, %v237_v23  ;;  %v246_v35 = vmul.f32 %v238_v25, %v238_v25  ;;  %v265_v50 = vsub.f32 %v565_v5, %v237_v23  ;;  %v266_v58 = vsub.f32 %v559_v2, %v238_v25 }
  0xa1   : > { %v230_v26 = vpop.xlane.xlu1 %229  ;;  %v224_v27 = vpop.xlane.xlu0 %223 }
  0xa2   : > { %v241_v30 = vmul.f32 0.0625, %v230_v26  ;;  %v239_v31 = vmul.f32 0.0625, %v224_v27 }
  0xa4   : > { %v249_v32 = vsub.f32 %v241_v30, %v245_v29  ;;  %v247_v33 = vsub.f32 %v239_v31, %v243_v28 }
  0xa5   : > { %v233_v36 = vpop.xlane.xlu1 %232  ;;  %v227_v37 = vpop.xlane.xlu0 %226 }
  0xa6   : > { %v253_v38 = vmax.f32 %v249_v32, 0.0  ;;  %v251_v39 = vmax.f32 %v247_v33, 0.0  ;;  %v242_v40 = vmul.f32 0.0625, %v233_v36  ;;  %v240_v41 = vmul.f32 0.0625, %v227_v37 }
  0xa8   : > { %v257_v42 = vadd.f32 1e-05, %v253_v38  ;;  %v255_v43 = vadd.f32 1e-05, %v251_v39  ;;  %v250_v44 = vsub.f32 %v242_v40, %v246_v35  ;;  %v248_v45 = vsub.f32 %v240_v41, %v244_v34 }
  0xaa   : > { %498 = vrsqrt.f32 %v257_v42  ;;  %v254_v46 = vmax.f32 %v250_v44, 0.0  ;;  %v252_v47 = vmax.f32 %v248_v45, 0.0 }
  0xab   : > { %500 = vrsqrt.f32 %v255_v43 }
  0xac   : > { %v258_v48 = vadd.f32 1e-05, %v254_v46  ;;  %v256_v49 = vadd.f32 1e-05, %v252_v47 }
  0xae   : > { %502 = vrsqrt.f32 %v258_v48 }
  0xaf   : > { %504 = vrsqrt.f32 %v256_v49 }
  0xb7   : > { %v499_v51 = vpop.eup %498 }
  0xb8   : > { %v501_v54 = vpop.eup %500  ;;  %v269_v55 = vmul.f32 %v499_v51, %v265_v50 }
  0xb9   : > { %v267_v56 = vmul.f32 %v501_v54, %v263_v52 }
  0xba   : > { %v280_v59 = vmul.f32 %v462_v53, %v269_v55 }
  0xbb   : > { %v503_v60 = vpop.eup %502  ;;  %v278_v62 = vmul.f32 %v462_v53, %v267_v56 }
  0xbc   : > { %v505_v63 = vpop.eup %504  ;;  %v291_v1 = vadd.f32 %v463_v57, %v280_v59  ;;  %v270_v3 = vmul.f32 %v503_v60, %v266_v58 }
  0xbd   : > { %v289_v4 = vadd.f32 %v463_v57, %v278_v62  ;;  %v268_v5 = vmul.f32 %v505_v63, %v264_v61 }
  0xbe   : > { %483 = vmatprep.mubr.msk.f32.mxu1 %vm205_vm0, %v291_v1  ;;  %v281_v6 = vmul.f32 %v462_v53, %v270_v3 }
  0xbf   : > { %480 = vmatprep.mubr.msk.f32.mxu0 %vm205_vm0, %v289_v4  ;;  %v279_v7 = vmul.f32 %v462_v53, %v268_v5 }
  0xc0   : > { %v292_v8 = vadd.f32 %v463_v57, %v281_v6 }
  0xc1   : > { %v290_v9 = vadd.f32 %v463_v57, %v279_v7 }
  0xc2   : > { %484 = vmatmul.mubr.msk.f32.vlgmr.msra.gmra.mxu1 %vm205_vm0, %v292_v8 }
  0xc3   : > { %481 = vmatmul.mubr.msk.f32.vlgmr.msra.gmra.mxu0 %vm205_vm0, %v290_v9 }
 0x182   : > { %v485_v0 = vpop.f32.mrf.mxu1 }
 0x183   : > { %v482_v2 = vpop.f32.mrf.mxu0  ;;  %396 = vst.msk [vmem:[%s199_s6 + $0x18] sm:$0xff] %vm392_vm1, %v485_v0 }
 0x184   : > { %394 = vst.msk [vmem:[%s199_s6 + $0x8] sm:$0xff] %vm392_vm1, %v482_v2  ;;  %v383_v10 = vpop.f32.mrf.mxu1 }
 0x185   : > { %v373_v11 = vpop.f32.mrf.mxu0  ;;  %395 = vst.msk [vmem:[%s199_s6 + $0x10] sm:$0xff] %vm392_vm1, %v383_v10 }
 0x186   : > { %393 = vst.msk [vmem:[%s199_s6] sm:$0xff] %vm392_vm1, %v373_v11 }
 0x187 PF: > { %s14_s15 = sadd.s32 1, %s512_s15  }
 0x188   : > { %p11_p4 = scmp.ge.s32.totalorder %s14_s15, 6  }
 0x18a   :  { %13 = sbr.rel (!%p11_p4) target bundleno = 1 (0x1), region = 66 }

</bundles_post_ra>
